<compile_context>
chip_gen: v7x
topology: tpu7x:2x2x1
jax: 0.10.0
libtpu: 0.0.40
codegen_flags: <defaults>
</compile_context>

<pallas_src>
import functools

import jax
import jax.numpy as jnp
import numpy as np
from jax.experimental import pallas as pl
from jax.experimental.pallas import tpu as pltpu


def _pool_kernel(x_ref, m_ref, o_ref, *, inv_area):
    x = x_ref[...]
    m = m_ref[...]
    if x.dtype == jnp.bfloat16:
        # bf16 x bf16 MXU operands, f32 accumulate (m entries are 0/1, exact).
        pass
    else:
        x = x.astype(jnp.float32)
        m = m.astype(jnp.float32)
    acc = jnp.dot(x, m, preferred_element_type=jnp.float32)
    # Exact 1/stride^2 scale applied once in f32 (rides a free VALU slot).
    o_ref[...] = (acc * jnp.float32(inv_area)).astype(o_ref.dtype)


def _pool_matrix(H, W, stride, fold):
    """0/1 pooling matrix built with numpy at trace time (compile-time const).

    pooled_flat = x_flat @ m, m[h*W + w, (h//s)*ws + (w//s)] = 1 for the valid
    (floor-mode, no padding) region; rows/cols past hs*s / ws*s are dropped.
    Folded variant is kron(I_fold, m) for lane-dense outputs.
    """
    hs, ws = H // stride, W // stride
    K, P = H * W, hs * ws
    m = np.zeros((K, P), dtype=np.float32)
    for h in range(hs * stride):
        row = h * W
        col = (h // stride) * ws
        for w in range(ws * stride):
            m[row + w, col + w // stride] = 1.0
    if fold > 1:
        m = np.kron(np.eye(fold, dtype=np.float32), m)
    return jnp.asarray(m, dtype=jnp.bfloat16)


def _pick_fold(R, P):
    """Fold g rows into lanes so the output lane width g*P reaches >= 128."""
    target = max(1, -(-128 // P))  # ceil(128 / P)
    g = min(target, R)
    while g > 1 and R % g != 0:
        g -= 1
    return g


def _pick_block_rows(rows, row_bytes, target_bytes=4 << 20):
    """Fixed ~target_bytes input slab, multiple of 8 rows; cdiv grid handles
    the ragged tail, so no divisor requirement on `rows`."""
    tr = max(8, (int(target_bytes) // max(int(row_bytes), 1)) // 8 * 8)
    rows_up8 = -(-rows // 8) * 8
    return int(min(tr, rows_up8))


def _grid_semantics():
    """CORE_PARALLEL on dual-TensorCore chips (v7x), PARALLEL otherwise."""
    try:
        kind = jax.devices()[0].device_kind.lower()
    except Exception:
        kind = ""
    if "7" in kind:
        return (pltpu.CORE_PARALLEL,)
    return (pltpu.PARALLEL,)


def _avg_pool_pallas(x, stride):
    """AvgPool2d(kernel=stride, stride=stride) on NCHW input via one Pallas matmul."""
    N, C, H, W = x.shape
    hs, ws = H // stride, W // stride
    K, P = H * W, hs * ws
    R = N * C

    g = _pick_fold(R, P)
    Rg, Kg, Pg = R // g, g * K, g * P

    m = _pool_matrix(H, W, stride, g)

    # Free (contiguous) reshape -> lane-dense rows, g original rows per slab row.
    x2 = x.reshape(Rg, Kg)
    itemsize = x.dtype.itemsize
    tr = _pick_block_rows(Rg, Kg * itemsize)
    grid = (pl.cdiv(Rg, tr),)

    in_bytes = tr * Kg * itemsize
    out_bytes = tr * Pg * itemsize
    m_bytes = Kg * Pg * m.dtype.itemsize
    # 2x (double-buffered) input + output slabs + pooling matrix, with margin;
    # floor at the 32 MiB default so we never lower the scoped limit, cap well
    # under v7x's 64 MiB physical VMEM.
    vmem_limit = int(
        min(48 << 20, max(32 << 20, 2 * (in_bytes + out_bytes + m_bytes) + (4 << 20)))
    )

    kernel = functools.partial(_pool_kernel, inv_area=1.0 / float(stride * stride))

    out2 = pl.pallas_call(
        kernel,
        out_shape=jax.ShapeDtypeStruct((Rg, Pg), x.dtype),
        grid=grid,
        in_specs=[
            pl.BlockSpec((tr, Kg), lambda i: (i, 0)),
            # Constant block index -> pooling matrix stays resident in VMEM.
            pl.BlockSpec((Kg, Pg), lambda i: (0, 0)),
        ],
        out_specs=pl.BlockSpec((tr, Pg), lambda i: (i, 0)),
        compiler_params=pltpu.CompilerParams(
            dimension_semantics=_grid_semantics(),
            vmem_limit_bytes=vmem_limit,
        ),
        cost_estimate=pl.CostEstimate(
            flops=2 * Rg * Kg * Pg,
            transcendentals=0,
            bytes_accessed=int(
                Rg * Kg * itemsize + Kg * Pg * m.dtype.itemsize + Rg * Pg * itemsize
            ),
        ),
    )(x2, m)

    return out2.reshape(N, C, hs, ws)


def shortcut(x, in_planes, planes, stride):
    """Forward pass of Shortcut(in_planes, planes, stride) for NCHW input."""
    N, C, H, W = x.shape
    assert C == in_planes, "input channel count must equal in_planes"
    assert planes >= in_planes, "Shortcut only zero-pads channels upward"

    if stride == 1:
        pooled = x  # AvgPool2d is Identity when stride == 1
    else:
        pooled = _avg_pool_pallas(x, stride)

    if planes != in_planes:
        # Layout-only zero pad of the (small) pooled tensor; padded channels
        # are never read inside the kernel.
        pooled = jnp.pad(
            pooled, ((0, 0), (0, planes - in_planes), (0, 0), (0, 0))
        )
    return pooled


def _reference(x, in_planes, planes, stride):
    # Pure-JAX reference (AvgPool2d floor-mode + channel zero-pad), in f32.
    xf = x.astype(jnp.float32)
    N, C, H, W = xf.shape
    hs, ws = (H // stride, W // stride) if stride != 1 else (H, W)
    if stride == 1:
        pooled = xf
    else:
        xc = xf[:, :, : hs * stride, : ws * stride]
        pooled = xc.reshape(N, C, hs, stride, ws, stride).mean(axis=(3, 5))
    if planes != in_planes:
        pooled = jnp.pad(
            pooled, ((0, 0), (0, planes - in_planes), (0, 0), (0, 0))
        )
    return pooled


if __name__ == "__main__":
    key = jax.random.PRNGKey(0)

    # Case 1: canonical ResNet shortcut shape, f32, stride 2, channel pad 4->8.
    in_planes, planes, stride = 4, 8, 2
    x = jax.random.normal(key, (2, in_planes, 16, 16), dtype=jnp.float32)
    out = jax.block_until_ready(shortcut(x, in_planes, planes, stride))
    ref = _reference(x, in_planes, planes, stride)
    assert out.shape == ref.shape == (2, planes, 8, 8)
    assert jnp.allclose(out, ref, atol=1e-5, rtol=1e-5)

    # Case 2: bf16 path (looser tolerance for the bf16 output cast).
    xb = x.astype(jnp.bfloat16)
    out_b = jax.block_until_ready(shortcut(xb, in_planes, planes, stride))
    ref_b = _reference(xb, in_planes, planes, stride)
    assert out_b.dtype == jnp.bfloat16
    assert jnp.allclose(out_b.astype(jnp.float32), ref_b, atol=2e-2, rtol=2e-2)

    # Case 3: stride 1 -> identity + channel pad only.
    out1 = jax.block_until_ready(shortcut(x, in_planes, planes, 1))
    ref1 = _reference(x, in_planes, planes, 1)
    assert out1.shape == (2, planes, 16, 16)
    assert jnp.allclose(out1, ref1, atol=1e-6, rtol=1e-6)

    # Case 4: ragged row count (N*C = 15, no fold/divisor), no channel pad.
    key2 = jax.random.PRNGKey(1)
    xr = jax.random.normal(key2, (3, 5, 16, 16), dtype=jnp.float32)
    out_r = jax.block_until_ready(shortcut(xr, 5, 5, 2))
    ref_r = _reference(xr, 5, 5, 2)
    assert out_r.shape == ref_r.shape == (3, 5, 8, 8)
    assert jnp.allclose(out_r, ref_r, atol=1e-5, rtol=1e-5)

    print("KERNEL_OK")
</pallas_src>

<mosaic_0001>
module attributes {stable_mosaic.version = 11 : i64} {
  func.func @_pool_kernel(%arg0: i32, %arg1: memref<8x512xf32, #tpu.memory_space<vmem>>, %arg2: memref<512x128xbf16, #tpu.memory_space<vmem>>, %arg3: memref<8x128xf32, #tpu.memory_space<vmem>>) attributes {dimension_semantics = [#tpu.dimension_semantics<parallel>], iteration_bounds = array<i64: 1>, scalar_prefetch = 0 : i64, scratch_operands = 0 : i64, tpu.core_type = #tpu.core_type<tc>, window_params = [{transform_indices = @transform_0, window_bounds = array<i64: 8, 512>}, {pipeline_mode = #tpu.pipeline_mode<synchronous>, transform_indices = @transform_1, window_bounds = array<i64: 512, 128>}, {transform_indices = @transform_2, window_bounds = array<i64: 8, 128>}]} {
    %c0 = arith.constant 0 : index
    %c0_0 = arith.constant 0 : index
    %0 = vector.load %arg1[%c0, %c0_0] : memref<8x512xf32, #tpu.memory_space<vmem>>, vector<8x512xf32>
    %c0_1 = arith.constant 0 : index
    %c0_2 = arith.constant 0 : index
    %1 = vector.load %arg2[%c0_1, %c0_2] : memref<512x128xbf16, #tpu.memory_space<vmem>>, vector<512x128xbf16>
    %2 = arith.extf %1 : vector<512x128xbf16> to vector<512x128xf32>
    %cst = arith.constant dense<0.000000e+00> : vector<8x128xf32>
    %3 = tpu.matmul %0, %2, %cst {dimension_numbers = #tpu.dot_dimension_numbers<[1], [0], [0], [1], [0, 0, 1, 1], [], []>} : vector<8x512xf32>, vector<512x128xf32>, vector<8x128xf32> -> vector<8x128xf32>
    %cst_3 = arith.constant 2.500000e-01 : f32
    %4 = vector.broadcast %cst_3 : f32 to vector<8x128xf32>
    %5 = arith.mulf %3, %4 : vector<8x128xf32>
    %c0_4 = arith.constant 0 : index
    %c0_5 = arith.constant 0 : index
    %6 = vector.load %arg3[%c0_4, %c0_5] : memref<8x128xf32, #tpu.memory_space<vmem>>, vector<8x128xf32>
    tpu.vector_store %arg3[%c0_4, %c0_5], %5 {strides = array<i32>} : memref<8x128xf32, #tpu.memory_space<vmem>>, vector<8x128xf32>,
    return
  }
  func.func @transform_0(%arg0: i32) -> (i32, i32) {
    %c0_i32 = arith.constant 0 : i32
    %c0_i32_0 = arith.constant 0 : i32
    return %arg0, %c0_i32 : i32, i32
  }
  func.func @transform_1(%arg0: i32) -> (i32, i32) {
    %c0_i32 = arith.constant 0 : i32
    %c0_i32_0 = arith.constant 0 : i32
    %c0_i32_1 = arith.constant 0 : i32
    return %c0_i32, %c0_i32_0 : i32, i32
  }
  func.func @transform_2(%arg0: i32) -> (i32, i32) {
    %c0_i32 = arith.constant 0 : i32
    %c0_i32_0 = arith.constant 0 : i32
    return %arg0, %c0_i32 : i32, i32
  }
}

</mosaic_0001>

<bundles_post_ra>
// kernel: tpu_custom_call.1
= control target key start
LH: loop header
LB: loop body
LE: loop exit
PB: predicated region body
PF: predicated region fallthrough
CT: control target
= control target key end

     0   :  { %7 = vsyncpa [#allocation3], 0  ;;  %s786_s0 = inlined_call_operand.hbm [shape: f32[4,512], index: 0, kind: input, shape index: {}]   ;;  %s787_s1 = inlined_call_operand.hbm [shape: bf16[512,128], index: 1, kind: input, shape index: {}]   ;;  %s788_s2 = inlined_call_operand.hbm [shape: f32[4,128], index: 2, kind: output, shape index: {}]  }
   0x1   :  { %8 = vsyncpa [#allocation6], 0 }
   0x2   :  { %9 = vsyncpa [#allocation4], 0 }
   0x3   :  { %14 = vsyncadd [#allocation3], 256  ;;  %s722_s9 = smov [#allocation2]   ;;  %s650_s13 = scalar_lea.hbm %s786_s0, 256 }
   0x4   :  { %s15_s10 = sshll.u32 %s722_s9, 4  ;;  %p651_p0 = scmp.ne.s32.totalorder %s786_s0, %s650_s13  ;;  %s16_s10 = int_to_ptr.vmem [resolvable:$true] %s15_s10 }
   0x5   :  { %p654_p1 = scmp.lt.u32.totalorder %s650_s13, %s786_s0 }
   0x7   :  { %p656_p2 = pnand %p654_p1, %p651_p0 }
   0x9   :  { %659 = shalt.err (!%p656_p2)
}
   0xa   :  { %s660_s18 = scalar_lea.vmem %s16_s10, 256  ;;  %s664_s19 = scalar_lea.vmem %s16_s10, 512 }
   0xb   :  { %p661_p3 = scmp.ne.s32.totalorder %s16_s10, %s660_s18  ;;  %p665_p4 = scmp.lt.s32.totalorder %s16_s10, %s16_s10 }
   0xc   :  { %p666_p5 = scmp.lt.s32.totalorder %s664_s19, %s660_s18 }
   0xe   :  { %p667_p6 = por %p666_p5, %p665_p4 }
  0x10   :  { %p668_p7 = pnand %p667_p6, %p661_p3 }
  0x12   :  { %671 = shalt.err (!%p668_p7)
}
  0x13   :  { %s723_s20 = smov 256   ;;  %s724_s21 = smov 16  }
  0x14   :  { %21 = dma.hbm_to_vmem [thread:$0]  %s786_s0, 256, %s16_s10, [#allocation3], %s723_s20, %s723_s20, %s724_s21  }
  0x15   :  { %s725_s24 = smov [#allocation5]   ;;  %s672_s28 = scalar_lea.hbm %s787_s1, 4096 }
  0x16   :  { %s27_s25 = sshll.u32 %s725_s24, 4  ;;  %p673_p8 = scmp.ne.s32.totalorder %s787_s1, %s672_s28  ;;  %s28_s25 = int_to_ptr.vmem [resolvable:$true] %s27_s25 }
  0x17   :  { %p676_p9 = scmp.lt.u32.totalorder %s672_s28, %s787_s1 }
  0x19   :  { %p678_p10 = pnand %p676_p9, %p673_p8 }
  0x1b   :  { %681 = shalt.err (!%p678_p10)
}
  0x1c   :  { %s682_s5 = scalar_lea.vmem %s28_s25, 4096  ;;  %p687_p12 = scmp.lt.s32.totalorder %s28_s25, %s28_s25 }
  0x1d   :  { %p683_p11 = scmp.ne.s32.totalorder %s28_s25, %s682_s5  ;;  %p688_p13 = scmp.lt.s32.totalorder %s682_s5, %s682_s5 }
  0x1f   :  { %p689_p0 = por %p688_p13, %p687_p12 }
  0x21   :  { %p690_p1 = pnand %p689_p0, %p683_p11 }
  0x23   :  { %693 = shalt.err (!%p690_p1)
}
  0x24   :  { %s726_s0 = smov 64   ;;  %s727_s6 = smov 4  }
  0x25   :  { %33 = dma.hbm_to_vmem [thread:$0]  %s787_s1, 4096, %s28_s25, [#allocation6], %s726_s0, %s726_s0, %s727_s6  }
  0x26   :  { %716 = dma.done.wait [#allocation3], 512  }
  0x27   :  { %717 = vsyncadd [#allocation3], 4294966784 }
  0x28   :  { %718 = dma.done.wait [#allocation6], 4096  }
  0x29   :  { %719 = vsyncadd [#allocation6], 4294963200  ;;  %v479_v0 = vld [vmem:[#allocation5 + $0x40] sm:$0xff]   ;;  %v480_v4 = vld [vmem:[#allocation5 + $0x48] sm:$0xff]  }
  0x2a   :  { %v495_v1 = vld [vmem:[#allocation5 + $0xc0] sm:$0xff]   ;;  %574 = vmatprep.subr.bf16.mxu0 %v479_v0  ;;  %v496_v5 = vld [vmem:[#allocation5 + $0xc8] sm:$0xff]   ;;  %v481_v8 = vld [vmem:[#allocation5 + $0x50] sm:$0xff]  }
  0x2b   :  { %v345_v2 = vld [vmem:[#allocation5] sm:$0xff]   ;;  %606 = vmatprep.subr.bf16.mxu1 %v495_v1  ;;  %v472_v6 = vld [vmem:[#allocation5 + $0x8] sm:$0xff]   ;;  %v497_v9 = vld [vmem:[#allocation5 + $0xd0] sm:$0xff]  }
  0x2c   :  { %v487_v3 = vld [vmem:[#allocation5 + $0x80] sm:$0xff]   ;;  %576 = vmatpush3.bf16.msra.mxu0 %v345_v2  ;;  %v488_v7 = vld [vmem:[#allocation5 + $0x88] sm:$0xff]   ;;  %v473_v10 = vld [vmem:[#allocation5 + $0x10] sm:$0xff]  }
  0x2d   :  { %608 = vmatpush3.bf16.msra.mxu1 %v487_v3  ;;  %578 = vmatprep.subr.bf16.mxu0 %v480_v4  ;;  %v489_v11 = vld [vmem:[#allocation5 + $0x90] sm:$0xff]   ;;  %v482_v12 = vld [vmem:[#allocation5 + $0x58] sm:$0xff]   ;;  %v483_v16 = vld [vmem:[#allocation5 + $0x60] sm:$0xff]  }
  0x2e   :  { %610 = vmatprep.subr.bf16.mxu1 %v496_v5  ;;  %v498_v13 = vld [vmem:[#allocation5 + $0xd8] sm:$0xff]   ;;  %v646_v17 = vld [vmem:[#allocation2 + $0x4] ss:$16 sps:$4 sm:$0xff]   ;;  %v484_v22 = vld [vmem:[#allocation5 + $0x68] sm:$0xff]  }
  0x2f   :  { %v474_v14 = vld [vmem:[#allocation5 + $0x18] sm:$0xff]   ;;  %v499_v18 = vld [vmem:[#allocation5 + $0xe0] sm:$0xff]   ;;  %248 = vmatprep.mubr.f32.mxu0 %v646_v17  ;;  %v500_v23 = vld [vmem:[#allocation5 + $0xe8] sm:$0xff]  }
  0x30   :  { %580 = vmatpush3.bf16.msra.mxu0 %v472_v6  ;;  %v490_v15 = vld [vmem:[#allocation5 + $0x98] sm:$0xff]   ;;  %v475_v20 = vld [vmem:[#allocation5 + $0x20] sm:$0xff]   ;;  %v476_v24 = vld [vmem:[#allocation5 + $0x28] sm:$0xff]  }
  0x31   :  { %612 = vmatpush3.bf16.msra.mxu1 %v488_v7  ;;  %582 = vmatprep.subr.bf16.mxu0 %v481_v8  ;;  %v649_v19 = vld [vmem:[#allocation2 + $0xc] ss:$16 sps:$4 sm:$0xff]   ;;  %v491_v21 = vld [vmem:[#allocation5 + $0xa0] sm:$0xff]   ;;  %v485_v26 = vld [vmem:[#allocation5 + $0x70] sm:$0xff]  }
  0x32   :  { %614 = vmatprep.subr.bf16.mxu1 %v497_v9  ;;  %318 = vmatprep.mubr.f32.mxu1 %v649_v19  ;;  %v492_v25 = vld [vmem:[#allocation5 + $0xa8] sm:$0xff]   ;;  %v501_v27 = vld [vmem:[#allocation5 + $0xf0] sm:$0xff]   ;;  %v486_v30 = vld [vmem:[#allocation5 + $0x78] sm:$0xff]  }
  0x33   :  { %v477_v28 = vld [vmem:[#allocation5 + $0x30] sm:$0xff]   ;;  %v502_v31 = vld [vmem:[#allocation5 + $0xf8] sm:$0xff]  }
  0x34   :  { %584 = vmatpush3.bf16.msra.mxu0 %v473_v10  ;;  %v493_v29 = vld [vmem:[#allocation5 + $0xb0] sm:$0xff]   ;;  %v478_v32 = vld [vmem:[#allocation5 + $0x38] sm:$0xff]  }
  0x35   :  { %616 = vmatpush3.bf16.msra.mxu1 %v489_v11  ;;  %586 = vmatprep.subr.bf16.mxu0 %v482_v12  ;;  %v494_v33 = vld [vmem:[#allocation5 + $0xb8] sm:$0xff]   ;;  %v644_v34 = vld [vmem:[#allocation2] ss:$16 sps:$4 sm:$0xff]  }
  0x36   :  { %618 = vmatprep.subr.bf16.mxu1 %v498_v13  ;;  %v647_v35 = vld [vmem:[#allocation2 + $0x8] ss:$16 sps:$4 sm:$0xff]  }
  0x38   :  { %588 = vmatpush3.bf16.msra.mxu0 %v474_v14 }
  0x39   :  { %620 = vmatpush3.bf16.msra.mxu1 %v490_v15  ;;  %590 = vmatprep.subr.bf16.mxu0 %v483_v16 }
  0x3a   :  { %622 = vmatprep.subr.bf16.mxu1 %v499_v18 }
  0x3c   :  { %592 = vmatpush3.bf16.msra.mxu0 %v475_v20 }
  0x3d   :  { %624 = vmatpush3.bf16.msra.mxu1 %v491_v21  ;;  %594 = vmatprep.subr.bf16.mxu0 %v484_v22 }
  0x3e   :  { %626 = vmatprep.subr.bf16.mxu1 %v500_v23 }
  0x40   :  { %596 = vmatpush3.bf16.msra.mxu0 %v476_v24 }
  0x41   :  { %628 = vmatpush3.bf16.msra.mxu1 %v492_v25  ;;  %598 = vmatprep.subr.bf16.mxu0 %v485_v26 }
  0x42   :  { %630 = vmatprep.subr.bf16.mxu1 %v501_v27 }
  0x44   :  { %600 = vmatpush3.bf16.msra.mxu0 %v477_v28 }
  0x45   :  { %632 = vmatpush3.bf16.msra.mxu1 %v493_v29  ;;  %602 = vmatprep.subr.bf16.mxu0 %v486_v30 }
  0x46   :  { %634 = vmatprep.subr.bf16.mxu1 %v502_v31 }
  0x48   :  { %604 = vmatpush3.bf16.msra.mxu0 %v478_v32 }
  0x49   :  { %636 = vmatpush3.bf16.msra.mxu1 %v494_v33 }
  0x4b   :  { %249 = vmatmul.mubr.f32.vlgmr.msra.gmra.mrb[0].mxu0 %v644_v34 }
  0x4c   :  { %319 = vmatmul.mubr.f32.vlgmr.msra.gmra.mrb[0].mxu1 %v647_v35 }
 0x11e   :  { %v535_v36 = vpop.f32.mrb[0].mxu0 }
 0x11f   :  { %v570_v37 = vpop.f32.mrb[0].mxu1  ;;  %v536_v38 = vpop.f32.mrb[1].mxu0 }
 0x120   :  { %v571_v39 = vpop.f32.mrb[1].mxu1  ;;  %v537_v40 = vadd.f32 %v536_v38, %v535_v36 }
 0x121   :  { %v572_v41 = vadd.f32 %v571_v39, %v570_v37 }
 0x123   :  { %v321_v42 = vadd.f32 %v572_v41, %v537_v40 }
 0x125   :  { %v324_v43 = vmul.f32 0.25, %v321_v42 }
 0x127   :  { %325 = vst [vmem:[#allocation7] sm:$0xff] %v324_v43 }
 0x128   :  { %330 = vsyncadd [#allocation4], 64  ;;  %s728_s1 = smov [#allocation7]  }
 0x129   :  { %s331_s9 = sshll.u32 %s728_s1, 4  ;;  %s332_s9 = int_to_ptr.vmem [resolvable:$true] %s331_s9 }
 0x12a   :  { %s694_s10 = scalar_lea.vmem %s332_s9, 64  ;;  %s698_s11 = scalar_lea.vmem %s332_s9, 128 }
 0x12b   :  { %p695_p2 = scmp.ne.s32.totalorder %s332_s9, %s694_s10  ;;  %p699_p3 = scmp.lt.s32.totalorder %s332_s9, %s332_s9 }
 0x12c   :  { %p700_p4 = scmp.lt.s32.totalorder %s698_s11, %s694_s10 }
 0x12e   :  { %p701_p5 = por %p700_p4, %p699_p3 }
 0x130   :  { %p702_p6 = pnand %p701_p5, %p695_p2 }
 0x132   :  { %705 = shalt.err (!%p702_p6)
}
 0x133   :  { %s706_s14 = scalar_lea.hbm %s788_s2, 64 }
 0x134   :  { %p707_p7 = scmp.ne.s32.totalorder %s788_s2, %s706_s14  ;;  %p710_p8 = scmp.lt.u32.totalorder %s706_s14, %s788_s2 }
 0x136   :  { %p712_p9 = pnand %p710_p8, %p707_p7 }
 0x138   :  { %715 = shalt.err (!%p712_p9)
}
 0x139   :  { %337 = dma.vmem_to_hbm [thread:$0]  %s332_s9, 64, %s788_s2, [#allocation4], %s726_s0, %s726_s0, %s727_s6  }
 0x13a   :  { %720 = dma.done.wait [#allocation4], 128  }
 0x13b   :  { %721 = vsyncadd [#allocation4], 4294967168 }
 0x13c   :  { %341 = vsyncpa [#allocation3], 1 }
 0x13d   :  { %342 = vsyncpa [#allocation6], 1 }
 0x13e   :  { %343 = vsyncpa [#allocation4], 1 }

</bundles_post_ra>
